<compile_context>
chip_gen: v7x
topology: tpu7x:2x2x1
jax: 0.10.0
libtpu: 0.0.40
codegen_flags: <defaults>
</compile_context>

<pallas_src>
import functools

import jax
import jax.numpy as jnp
from jax.experimental import pallas as pl
from jax.experimental.pallas import tpu as pltpu

_EPS = 1e-5  # PyTorch GroupNorm default eps


# ---------------------------------------------------------------------------
# Shared finalize math: fold group stats + conditional gamma/beta into a
# per-channel scale/shift so the apply is just  out = x * scale + shift.
# ---------------------------------------------------------------------------
def _finalize_scale_shift(sum_c, ssq_c, gamma, beta, m_gc, m_cg, inv_count, eps):
    # sum_c, ssq_c, gamma, beta : (C, 1) f32
    # m_gc : (G, C) f32 group-membership mask;  m_cg : (C, G) f32 (= m_gc.T)
    g_sum = jnp.dot(m_gc, sum_c, preferred_element_type=jnp.float32)   # (G, 1)
    g_ssq = jnp.dot(m_gc, ssq_c, preferred_element_type=jnp.float32)   # (G, 1)
    g_mean = g_sum * inv_count
    # biased variance (matches torch GroupNorm); clamp against cancellation
    g_var = jnp.maximum(g_ssq * inv_count - g_mean * g_mean, 0.0)
    mean_c = jnp.dot(m_cg, g_mean, preferred_element_type=jnp.float32)  # (C, 1)
    var_c = jnp.dot(m_cg, g_var, preferred_element_type=jnp.float32)    # (C, 1)
    # out = xn + xn*gamma + beta  ==  x * scale + shift
    scale = jax.lax.rsqrt(var_c + eps) * (1.0 + gamma)
    shift = beta - mean_c * scale
    return scale, shift


# ---------------------------------------------------------------------------
# Fused single-pass kernel: whole per-batch (C, HWp) slab resident in VMEM.
# ---------------------------------------------------------------------------
def _fused_kernel(x_ref, gb_ref, mgc_ref, mcg_ref, o_ref, *, inv_count, eps):
    # x_ref : (C, HWp)     gb_ref : (2, C, 1) = [gamma; beta]
    # mgc_ref : (G, C)     mcg_ref : (C, G)
    x = x_ref[...].astype(jnp.float32)
    sum_c = jnp.sum(x, axis=1, keepdims=True)        # (C, 1)
    ssq_c = jnp.sum(x * x, axis=1, keepdims=True)    # (C, 1)
    gamma = gb_ref[0].astype(jnp.float32)            # (C, 1)
    beta = gb_ref[1].astype(jnp.float32)             # (C, 1)
    scale, shift = _finalize_scale_shift(sum_c, ssq_c, gamma, beta,
                                         mgc_ref[...], mcg_ref[...],
                                         inv_count, eps)
    o_ref[...] = (x * scale + shift).astype(o_ref.dtype)


# ---------------------------------------------------------------------------
# Two-pass fallback kernels (large slabs).
# ---------------------------------------------------------------------------
def _stats_kernel(x_ref, gb_ref, mgc_ref, mcg_ref, ss_ref,
                  sum_ref, ssq_ref, *, inv_count, eps):
    # grid (N, T), T = HW tiles ("arbitrary" reduction axis, last)
    t = pl.program_id(1)

    @pl.when(t == 0)
    def _():
        sum_ref[...] = jnp.zeros_like(sum_ref)
        ssq_ref[...] = jnp.zeros_like(ssq_ref)

    x = x_ref[...].astype(jnp.float32)                      # (C, tile_hw)
    sum_ref[...] += jnp.sum(x, axis=1, keepdims=True)       # (C, 1)
    ssq_ref[...] += jnp.sum(x * x, axis=1, keepdims=True)   # (C, 1)

    @pl.when(t == pl.num_programs(1) - 1)
    def _():
        gamma = gb_ref[0].astype(jnp.float32)
        beta = gb_ref[1].astype(jnp.float32)
        scale, shift = _finalize_scale_shift(sum_ref[...], ssq_ref[...],
                                             gamma, beta,
                                             mgc_ref[...], mcg_ref[...],
                                             inv_count, eps)
        ss_ref[0] = scale
        ss_ref[1] = shift


def _apply_kernel(x_ref, ss_ref, o_ref):
    # out = x * scale + shift  (2 vector ops/element, lane-dense stores)
    scale = ss_ref[0].astype(jnp.float32)                   # (C, 1)
    shift = ss_ref[1].astype(jnp.float32)                   # (C, 1)
    o_ref[...] = (x_ref[...].astype(jnp.float32) * scale + shift).astype(o_ref.dtype)


# ---------------------------------------------------------------------------
# Wrapper
# ---------------------------------------------------------------------------
def _vmem_capacity_bytes():
    """Physical VMEM per TensorCore (128 MiB v5e/v6e, 64 MiB v7x)."""
    try:
        info = pltpu.get_tpu_info()
        for attr in ("vmem_capacity_bytes", "vmem_size_bytes", "vmem_bytes"):
            v = getattr(info, attr, None)
            if v:
                return int(v)
    except Exception:
        pass
    return 64 * 1024 * 1024  # conservative (v7x per-TC)


def _round_up(a, b):
    return -(-a // b) * b


def conditional_norm2d(x, y, w_gamma, w_beta, dim_group, *,
                       force_two_pass=False, _max_tile_hw=None):
    """x: (N, C, H, W) NCHW, y: (N, dim_cond). Returns (N, C, H, W)."""
    N, C, H, W = x.shape
    HW = H * W
    G = dim_group
    assert C % G == 0
    cpg = C // G
    # TRUE element count per group; zero padding is then stats-neutral.
    inv_count = 1.0 / float(cpg * HW)

    # Conditioning Linear (bias=False): ONE fused (N,Dc)x(Dc,2C) GEMM in XLA.
    w_gb = jnp.concatenate([w_gamma, w_beta], axis=0)                  # (2C, Dc)
    gb = y.astype(jnp.float32) @ w_gb.astype(jnp.float32).T            # (N, 2C)
    gb = gb.reshape(N, 2, C, 1)                                        # [gamma; beta]

    # Tiny group-membership masks, precomputed once (off the hot path).
    ch = jnp.arange(C, dtype=jnp.int32)
    grp = jnp.arange(G, dtype=jnp.int32)
    m_gc = (ch[None, :] // cpg == grp[:, None]).astype(jnp.float32)    # (G, C)
    m_cg = (ch[:, None] // cpg == grp[None, :]).astype(jnp.float32)    # (C, G)

    # Per-generation VMEM budget: 3/4 of physical (96 MiB v5e/v6e, 48 MiB v7x).
    vmem_cap = _vmem_capacity_bytes()
    vmem_limit = max(32 << 20, min((vmem_cap * 3) // 4, 128 << 20))

    itemsize = x.dtype.itemsize
    HW128 = _round_up(HW, 128)          # lane-dense padded spatial extent
    x2 = x.reshape(N, C, HW)

    # Fused single-pass gate: 2x in + 2x out double buffers + f32 temps fit.
    slab_io = C * HW128 * itemsize
    slab_f32 = C * HW128 * 4
    fused = (4 * slab_io + 3 * slab_f32) <= int(vmem_limit * 0.9)
    if force_two_pass:
        fused = False

    if fused:
        HWp = HW128
        if HWp != HW:
            x2 = jnp.pad(x2, ((0, 0), (0, 0), (0, HWp - HW)))
        out = pl.pallas_call(
            functools.partial(_fused_kernel, inv_count=inv_count, eps=_EPS),
            out_shape=jax.ShapeDtypeStruct((N, C, HWp), x.dtype),
            grid=(N,),
            in_specs=[
                pl.BlockSpec((None, C, HWp), lambda n: (n, 0, 0)),        # x slab
                pl.BlockSpec((None, 2, C, 1), lambda n: (n, 0, 0, 0)),    # gamma/beta
                pl.BlockSpec((G, C), lambda n: (0, 0)),                   # m_gc
                pl.BlockSpec((C, G), lambda n: (0, 0)),                   # m_cg
            ],
            out_specs=pl.BlockSpec((None, C, HWp), lambda n: (n, 0, 0)),
            compiler_params=pltpu.CompilerParams(
                dimension_semantics=("parallel",),
                vmem_limit_bytes=vmem_limit),
        )(x2, gb, m_gc, m_cg)
    else:
        # --- two-pass fallback: lane-dense (C, tile_hw) tiles sized from the
        #     VMEM budget (pass 2 keeps ~2x in + 2x out blocks + temps live) ---
        lane_budget = (vmem_limit // 8) // (max(itemsize, 4) * C)
        lane_budget = max(128, (lane_budget // 128) * 128)
        if _max_tile_hw is not None:
            lane_budget = max(128, min(lane_budget, (_max_tile_hw // 128) * 128))
        tile_hw = min(lane_budget, HW128)
        HWp = _round_up(HW, tile_hw)
        if HWp != HW:
            x2 = jnp.pad(x2, ((0, 0), (0, 0), (0, HWp - HW)))
        T = HWp // tile_hw

        # pass 1: per-batch fused scale/shift from group stats
        ss = pl.pallas_call(
            functools.partial(_stats_kernel, inv_count=inv_count, eps=_EPS),
            out_shape=jax.ShapeDtypeStruct((N, 2, C, 1), jnp.float32),
            grid=(N, T),
            in_specs=[
                pl.BlockSpec((None, C, tile_hw), lambda n, t: (n, 0, t)),
                pl.BlockSpec((None, 2, C, 1), lambda n, t: (n, 0, 0, 0)),
                pl.BlockSpec((G, C), lambda n, t: (0, 0)),
                pl.BlockSpec((C, G), lambda n, t: (0, 0)),
            ],
            out_specs=pl.BlockSpec((None, 2, C, 1), lambda n, t: (n, 0, 0, 0)),
            scratch_shapes=[pltpu.VMEM((C, 1), jnp.float32),
                            pltpu.VMEM((C, 1), jnp.float32)],
            compiler_params=pltpu.CompilerParams(
                dimension_semantics=("parallel", "arbitrary"),
                vmem_limit_bytes=vmem_limit),
        )(x2, gb, m_gc, m_cg)

        # pass 2: elementwise apply, fully parallel, lane-dense output tiles
        out = pl.pallas_call(
            _apply_kernel,
            out_shape=jax.ShapeDtypeStruct((N, C, HWp), x.dtype),
            grid=(N, T),
            in_specs=[
                pl.BlockSpec((None, C, tile_hw), lambda n, t: (n, 0, t)),
                pl.BlockSpec((None, 2, C, 1), lambda n, t: (n, 0, 0, 0)),
            ],
            out_specs=pl.BlockSpec((None, C, tile_hw), lambda n, t: (n, 0, t)),
            compiler_params=pltpu.CompilerParams(
                dimension_semantics=("parallel", "parallel"),
                vmem_limit_bytes=vmem_limit),
        )(x2, ss)

    if HWp != HW:
        out = out[:, :, :HW]
    return out.reshape(N, C, H, W)


# ---------------------------------------------------------------------------
# Pure-JAX reference (matches torch GroupNorm(affine=False) + bias-free Linear)
# ---------------------------------------------------------------------------
def _reference(x, y, w_gamma, w_beta, dim_group):
    N, C, H, W = x.shape
    G = dim_group
    xg = x.reshape(N, G, (C // G) * H * W).astype(jnp.float32)
    mean = xg.mean(axis=-1, keepdims=True)
    var = ((xg - mean) ** 2).mean(axis=-1, keepdims=True)
    xn = ((xg - mean) / jnp.sqrt(var + _EPS)).reshape(N, C, H, W)
    gamma = (y @ w_gamma.T).reshape(N, C, 1, 1)
    beta = (y @ w_beta.T).reshape(N, C, 1, 1)
    return (xn + xn * gamma + beta).astype(x.dtype)


def _check(out, ref, tag):
    assert out.shape == ref.shape, (tag, out.shape, ref.shape)
    err = float(jnp.max(jnp.abs(out.astype(jnp.float32) - ref.astype(jnp.float32))))
    assert jnp.allclose(out, ref, atol=1e-4, rtol=1e-4), (tag, err)


if __name__ == "__main__":
    key = jax.random.PRNGKey(0)
    kx, ky, kg, kb, kx2, ky2, kg2, kb2 = jax.random.split(key, 8)

    # --- case 1: lane-aligned spatial (16x16), fused single-pass path ---
    N, C, H, W = 2, 8, 16, 16
    dim_cond, dim_group = 32, 4
    x = jax.random.normal(kx, (N, C, H, W), dtype=jnp.float32)
    y = jax.random.normal(ky, (N, dim_cond), dtype=jnp.float32)
    w_gamma = jax.random.normal(kg, (C, dim_cond), dtype=jnp.float32) * 0.1
    w_beta = jax.random.normal(kb, (C, dim_cond), dtype=jnp.float32) * 0.1

    out = jax.block_until_ready(conditional_norm2d(x, y, w_gamma, w_beta, dim_group))
    _check(out, _reference(x, y, w_gamma, w_beta, dim_group), "fused")

    # --- case 1b: two-pass fallback path on the same input (T=2 tiles) ---
    out2 = jax.block_until_ready(
        conditional_norm2d(x, y, w_gamma, w_beta, dim_group,
                           force_two_pass=True, _max_tile_hw=128))
    _check(out2, _reference(x, y, w_gamma, w_beta, dim_group), "two_pass")

    # --- case 2: non-multiple-of-128 spatial (7x7) exercises zero padding ---
    N2, C2, H2, W2 = 2, 6, 7, 7
    dim_cond2, dim_group2 = 16, 3
    xb = jax.random.normal(kx2, (N2, C2, H2, W2), dtype=jnp.float32)
    yb = jax.random.normal(ky2, (N2, dim_cond2), dtype=jnp.float32)
    wgb = jax.random.normal(kg2, (C2, dim_cond2), dtype=jnp.float32) * 0.1
    wbb = jax.random.normal(kb2, (C2, dim_cond2), dtype=jnp.float32) * 0.1

    out3 = jax.block_until_ready(conditional_norm2d(xb, yb, wgb, wbb, dim_group2))
    _check(out3, _reference(xb, yb, wgb, wbb, dim_group2), "fused_padded")

    print("KERNEL_OK")
</pallas_src>

<mosaic_0001>
module attributes {stable_mosaic.version = 11 : i64} {
  func.func @_fused_kernel(%arg0: i32, %arg1: memref<1x8x256xf32, #tpu.memory_space<vmem>>, %arg2: memref<1x2x8x1xf32, #tpu.memory_space<vmem>>, %arg3: memref<4x8xf32, #tpu.memory_space<vmem>>, %arg4: memref<8x4xf32, #tpu.memory_space<vmem>>, %arg5: memref<1x8x256xf32, #tpu.memory_space<vmem>>) attributes {dimension_semantics = [#tpu.dimension_semantics<parallel>], iteration_bounds = array<i64: 2>, scalar_prefetch = 0 : i64, scratch_operands = 0 : i64, tpu.core_type = #tpu.core_type<tc>, window_params = [{transform_indices = @transform_0, window_bounds = array<i64: 1, 8, 256>}, {transform_indices = @transform_1, window_bounds = array<i64: 1, 2, 8, 1>}, {pipeline_mode = #tpu.pipeline_mode<synchronous>, transform_indices = @transform_2, window_bounds = array<i64: 4, 8>}, {pipeline_mode = #tpu.pipeline_mode<synchronous>, transform_indices = @transform_3, window_bounds = array<i64: 8, 4>}, {transform_indices = @transform_4, window_bounds = array<i64: 1, 8, 256>}]} {
    %c0 = arith.constant 0 : index
    %c0_0 = arith.constant 0 : index
    %c0_1 = arith.constant 0 : index
    %0 = vector.load %arg1[%c0, %c0_0, %c0_1] : memref<1x8x256xf32, #tpu.memory_space<vmem>>, vector<1x8x256xf32>
    %1 = vector.shape_cast %0 : vector<1x8x256xf32> to vector<8x256xf32>
    %cst = arith.constant dense<0.000000e+00> : vector<8xf32>
    %2 = vector.multi_reduction <add>, %1, %cst [1] : vector<8x256xf32> to vector<8xf32>
    %3 = vector.shape_cast %2 : vector<8xf32> to vector<8x1xf32>
    %4 = arith.mulf %1, %1 : vector<8x256xf32>
    %cst_2 = arith.constant dense<0.000000e+00> : vector<8xf32>
    %5 = vector.multi_reduction <add>, %4, %cst_2 [1] : vector<8x256xf32> to vector<8xf32>
    %6 = vector.shape_cast %5 : vector<8xf32> to vector<8x1xf32>
    %c0_3 = arith.constant 0 : index
    %c0_4 = arith.constant 0 : index
    %c0_5 = arith.constant 0 : index
    %c0_6 = arith.constant 0 : index
    %7 = vector.load %arg2[%c0_3, %c0_4, %c0_5, %c0_6] : memref<1x2x8x1xf32, #tpu.memory_space<vmem>>, vector<1x1x8x1xf32>
    %8 = vector.shape_cast %7 : vector<1x1x8x1xf32> to vector<8x1xf32>
    %c0_7 = arith.constant 0 : index
    %c1 = arith.constant 1 : index
    %c0_8 = arith.constant 0 : index
    %c0_9 = arith.constant 0 : index
    %9 = vector.load %arg2[%c0_7, %c1, %c0_8, %c0_9] : memref<1x2x8x1xf32, #tpu.memory_space<vmem>>, vector<1x1x8x1xf32>
    %10 = vector.shape_cast %9 : vector<1x1x8x1xf32> to vector<8x1xf32>
    %c0_10 = arith.constant 0 : index
    %c0_11 = arith.constant 0 : index
    %11 = vector.load %arg3[%c0_10, %c0_11] : memref<4x8xf32, #tpu.memory_space<vmem>>, vector<4x8xf32>
    %c0_12 = arith.constant 0 : index
    %c0_13 = arith.constant 0 : index
    %12 = vector.load %arg4[%c0_12, %c0_13] : memref<8x4xf32, #tpu.memory_space<vmem>>, vector<8x4xf32>
    %cst_14 = arith.constant dense<0.000000e+00> : vector<4x1xf32>
    %13 = tpu.matmul %11, %3, %cst_14 {dimension_numbers = #tpu.dot_dimension_numbers<[1], [0], [0], [1], [0, 0, 1, 1], [], []>} : vector<4x8xf32>, vector<8x1xf32>, vector<4x1xf32> -> vector<4x1xf32>
    %cst_15 = arith.constant dense<0.000000e+00> : vector<4x1xf32>
    %14 = tpu.matmul %11, %6, %cst_15 {dimension_numbers = #tpu.dot_dimension_numbers<[1], [0], [0], [1], [0, 0, 1, 1], [], []>} : vector<4x8xf32>, vector<8x1xf32>, vector<4x1xf32> -> vector<4x1xf32>
    %cst_16 = arith.constant 0.001953125 : f32
    %15 = vector.broadcast %cst_16 : f32 to vector<4x1xf32>
    %16 = arith.mulf %13, %15 : vector<4x1xf32>
    %cst_17 = arith.constant 0.001953125 : f32
    %17 = vector.broadcast %cst_17 : f32 to vector<4x1xf32>
    %18 = arith.mulf %14, %17 : vector<4x1xf32>
    %19 = arith.mulf %16, %16 : vector<4x1xf32>
    %20 = arith.subf %18, %19 : vector<4x1xf32>
    %cst_18 = arith.constant 0.000000e+00 : f32
    %21 = vector.broadcast %cst_18 : f32 to vector<4x1xf32>
    %22 = arith.maximumf %20, %21 : vector<4x1xf32>
    %cst_19 = arith.constant dense<0.000000e+00> : vector<8x1xf32>
    %23 = tpu.matmul %12, %16, %cst_19 {dimension_numbers = #tpu.dot_dimension_numbers<[1], [0], [0], [1], [0, 0, 1, 1], [], []>} : vector<8x4xf32>, vector<4x1xf32>, vector<8x1xf32> -> vector<8x1xf32>
    %cst_20 = arith.constant dense<0.000000e+00> : vector<8x1xf32>
    %24 = tpu.matmul %12, %22, %cst_20 {dimension_numbers = #tpu.dot_dimension_numbers<[1], [0], [0], [1], [0, 0, 1, 1], [], []>} : vector<8x4xf32>, vector<4x1xf32>, vector<8x1xf32> -> vector<8x1xf32>
    %cst_21 = arith.constant 9.99999974E-6 : f32
    %25 = vector.broadcast %cst_21 : f32 to vector<8x1xf32>
    %26 = arith.addf %24, %25 : vector<8x1xf32>
    %27 = math.rsqrt %26 : vector<8x1xf32>
    %cst_22 = arith.constant 1.000000e+00 : f32
    %28 = vector.broadcast %cst_22 : f32 to vector<8x1xf32>
    %29 = arith.addf %28, %8 : vector<8x1xf32>
    %30 = arith.mulf %27, %29 : vector<8x1xf32>
    %31 = arith.mulf %23, %30 : vector<8x1xf32>
    %32 = arith.subf %10, %31 : vector<8x1xf32>
    %33 = vector.broadcast %30 : vector<8x1xf32> to vector<8x256xf32>
    %34 = arith.mulf %1, %33 : vector<8x256xf32>
    %35 = vector.broadcast %32 : vector<8x1xf32> to vector<8x256xf32>
    %36 = arith.addf %34, %35 : vector<8x256xf32>
    %c0_23 = arith.constant 0 : index
    %c0_24 = arith.constant 0 : index
    %c0_25 = arith.constant 0 : index
    %37 = vector.load %arg5[%c0_23, %c0_24, %c0_25] : memref<1x8x256xf32, #tpu.memory_space<vmem>>, vector<1x8x256xf32>
    %38 = vector.shape_cast %37 : vector<1x8x256xf32> to vector<8x256xf32>
    %39 = vector.shape_cast %36 : vector<8x256xf32> to vector<1x8x256xf32>
    tpu.vector_store %arg5[%c0_23, %c0_24, %c0_25], %39 {strides = array<i32>} : memref<1x8x256xf32, #tpu.memory_space<vmem>>, vector<1x8x256xf32>,
    return
  }
  func.func @transform_0(%arg0: i32) -> (i32, i32, i32) {
    %c0_i32 = arith.constant 0 : i32
    %c0_i32_0 = arith.constant 0 : i32
    %c0_i32_1 = arith.constant 0 : i32
    return %arg0, %c0_i32, %c0_i32_0 : i32, i32, i32
  }
  func.func @transform_1(%arg0: i32) -> (i32, i32, i32, i32) {
    %c0_i32 = arith.constant 0 : i32
    %c0_i32_0 = arith.constant 0 : i32
    %c0_i32_1 = arith.constant 0 : i32
    %c0_i32_2 = arith.constant 0 : i32
    return %arg0, %c0_i32, %c0_i32_0, %c0_i32_1 : i32, i32, i32, i32
  }
  func.func @transform_2(%arg0: i32) -> (i32, i32) {
    %c0_i32 = arith.constant 0 : i32
    %c0_i32_0 = arith.constant 0 : i32
    %c0_i32_1 = arith.constant 0 : i32
    return %c0_i32, %c0_i32_0 : i32, i32
  }
  func.func @transform_3(%arg0: i32) -> (i32, i32) {
    %c0_i32 = arith.constant 0 : i32
    %c0_i32_0 = arith.constant 0 : i32
    %c0_i32_1 = arith.constant 0 : i32
    return %c0_i32, %c0_i32_0 : i32, i32
  }
  func.func @transform_4(%arg0: i32) -> (i32, i32, i32) {
    %c0_i32 = arith.constant 0 : i32
    %c0_i32_0 = arith.constant 0 : i32
    %c0_i32_1 = arith.constant 0 : i32
    return %arg0, %c0_i32, %c0_i32_0 : i32, i32, i32
  }
}

</mosaic_0001>

<bundles_post_ra>
// kernel: tpu_custom_call.1
= control target key start
LH: loop header
LB: loop body
LE: loop exit
PB: predicated region body
PF: predicated region fallthrough
CT: control target
= control target key end

     0   :  { %9 = vsyncpa [#allocation3], 0  ;;  %s957_s0 = inlined_call_operand.vmem [shape: f32[2,8,256], index: 0, kind: input, shape index: {}]   ;;  %s958_s1 = inlined_call_operand.vmem [shape: f32[2,2,8,1], index: 1, kind: input, shape index: {}]   ;;  %s959_s2 = inlined_call_operand.vmem [shape: f32[4,8], index: 2, kind: input, shape index: {}]   ;;  %s960_s3 = inlined_call_operand.vmem [shape: f32[8,4], index: 3, kind: input, shape index: {}]   ;;  %s961_s4 = inlined_call_operand.hbm [shape: f32[2,8,256], index: 4, kind: output, shape index: {}]  }
   0x1   :  { %11 = vsyncpa [#allocation3 + $0x1], 0  ;;  %s829_s15 = smov 0   ;;  %s831_s16 = smov 0  }
   0x2   :  { %s833_s17 = smov 0   ;;  %s835_s18 = smov 0  }
   0x3 LB: > { %s850_s19 = sadd.s32 4294967295, %s798_s18   ;;  %s638_s20 = sadd.s32 4294967294, %s798_s18   ;;  %s798_s18 = sphi %s835_s18, %s967_s18   ;;  %s794_s17 = sphi %s833_s17, %s966_s17   ;;  %s790_s16 = sphi %s831_s16, %s965_s16   ;;  %s786_s15 = sphi %s829_s15, %s964_s15  }
   0x4   : > { %s854_s21 = sadd.s32 1, %s798_s18   ;;  %s118_s22 = sadd.s32 1, %s794_s17 }
   0x5   : > { %s115_s23 = ssub.s32 %s798_s18, %s854_s21  ;;  %p128_p0 = scmp.ne.s32.totalorder %s794_s17, %s790_s16 }
   0x6   : > { %p116_p1 = scmp.eq.s32.totalorder %s115_s23, 0  ;;  %p129_p2 = scmp.eq.s32.totalorder %s850_s19, 1 }
   0x7   : > { %p134_p3 = scmp.ne.s32.totalorder %s790_s16, %s786_s15  ;;  %p135_p4 = scmp.eq.s32.totalorder %s638_s20, 1 }
   0x8   : > { %s865_s24 = scalar_select %p116_p1, %s794_s17, %s118_s22  }
   0x9   : > { %p867_p5 = por %p129_p2, %p128_p0  ;;  %p871_p6 = por %p135_p4, %p134_p3 }
   0xa   : > { %p641_p7 = scmp.ge.s32.totalorder %s798_s18, 1  ;;  %p175_p8 = scmp.lt.s32.totalorder %s798_s18, 3 }
   0xc   : > { %p176_p9 = pnand %p641_p7, %p175_p8 }
   0xd   : > { %p206_p10 = scmp.lt.s32.totalorder (!%p176_p9), %s850_s19, 1  ;;  %v800_v0 = vmov (!%p176_p9), 0.0   ;;  %vm801_vm0 = vmmov (!%p176_p9), 0   ;;  %v229_v7 = vld [vmem:[%s959_s2] sm:$0xf] (!%p176_p9)  ;;  %vm231_vm1 = vcmask (!%p176_p9), 64512  }
   0xe   : > { %179 = sbr.rel (%p176_p9) target bundleno = 769 (0x301), region = 36  ;;  %670 = vmatprep.subr.mxu0 (!%p176_p9), %v800_v0  ;;  %675 = vmatprep.subr.mxu1 (!%p176_p9), %v800_v0  ;;  %vm384_vm2 = vcmask (!%p176_p9), 1043456   ;;  %v230_v14 = vld [vmem:[%s960_s3] sm:$0xff] (!%p176_p9)  ;;  %vm380_vm3 = vcmask (!%p176_p9), 31744   ;;  %v802_v20 = vmov (!%p176_p9), 0   ;;  %s203_s13 = sand.u32 (!%p176_p9), 1, %s790_s16  }
   0xf   : > { %672 = vmatprep.mubr.msk.f32.mxu0 (!%p176_p9), %vm801_vm0, %v800_v0  ;;  %677 = vmatprep.mubr.msk.f32.mxu1 (!%p176_p9), %vm801_vm0, %v800_v0  ;;  %s642_s14 = sshll.u32 (!%p176_p9), %s203_s13, 4  ;;  %s661_s20 = sshll.u32 (!%p176_p9), %s850_s19, 8 }
  0x10   : > { %732 = vset.pattern.permute.xlu1 (!%p176_p9), %v802_v20  ;;  %733 = vset.pattern.permute.xlu0 (!%p176_p9), %v802_v20  ;;  %s205_s22 = scalar_lea.vmem (!%p176_p9), [#allocation2], %s642_s14  ;;  %s915_s29 = scalar_lea.hbm (!%p176_p9), %s961_s4, %s661_s20 }
  0x11   : > { %s567_s23 = sshll.u32 (!%p176_p9), %s205_s22, 4  ;;  %s917_s23 = int_to_ptr.vmem [resolvable:$true] %s567_s23 }
  0x12   : > { %s736_s30 = scalar_lea.vmem (!%p176_p9), %s917_s23, 256 }
  0x13   : > { %p737_p11 = scmp.ne.s32.totalorder (!%p176_p9), %s917_s23, %s736_s30 }
  0x15   : > { %s879_s27 = scalar_select %p206_p10, %s850_s19, 1 }
  0x16   : > { %s553_s19 = scalar_lea.sflag [#allocation3], %s203_s13  ;;  %p738_p12 = pnand %p737_p11, %p867_p5 }
  0x17   : > { %s659_s28 = sshll.u32 %s879_s27, 4 }
  0x18   : > { %s210_s5 = scalar_lea.vmem %s957_s0, %s659_s28  ;;  %s215_s12 = scalar_lea.vmem %s958_s1, %s659_s28 }
  0x19   : > { %v887_v1 = vld [vmem:[%s210_s5] sm:$0xff]  ;;  %v889_v2 = vld [vmem:[%s210_s5 + $0x8] sm:$0xff]  ;;  %p739_p13 = pneg %p738_p12  ;;  %s803_s5 = smov [#allocation2]  }
  0x1a   : > { %v218_v3 = vadd.f32 %v889_v2, %v887_v1  ;;  %v221_v4 = vmul.f32 %v887_v1, %v887_v1  ;;  %v222_v5 = vmul.f32 %v889_v2, %v889_v2  ;;  %v226_v26 = vld [vmem:[%s215_s12] sm:$0xff]  ;;  %v647_v30 = vld [vmem:[%s215_s12 + $0x8] sm:$0xff]  ;;  %s740_s6 = sshll.u32 %s803_s5, 4  ;;  %s741_s6 = int_to_ptr.vmem [resolvable:$false] %s740_s6 }
  0x1b   : > { %v532_v27 = vadd.f32 1.0, %v226_v26  ;;  %s742_s7 = scalar_lea.vmem %s741_s6, 512  ;;  %p743_p0 = scmp.lt.s32.totalorder %s917_s23, %s741_s6 }
  0x1c   : > { %219 = vadd.xlane.f32.xlu0 %v218_v3  ;;  %v223_v6 = vadd.f32 %v222_v5, %v221_v4  ;;  %p744_p1 = scmp.lt.s32.totalorder %s742_s7, %s736_s30 }
  0x1e   : > { %p745_p2 = por %p744_p1, %p743_p0 }
  0x20   : > { %224 = vadd.xlane.f32.xlu0 %v223_v6  ;;  %p746_p3 = pnand %p745_p2, %p739_p13 }
  0xa9   : > { %v220_v8 = vpop.xlane.xlu0 %219 }
  0xaa   : > { %671 = vmatpush3.msra.mxu0 %v220_v8 }
  0xab   : > { %673 = vmatmul.mubr.msk.f32.vlgmr.msra.gmra.mrb[0].mxu0 %vm231_vm1, %v229_v7  ;;  %680 = vmatprep.subr.mxu0 %v800_v0 }
  0xac   : > { %682 = vmatprep.mubr.msk.f32.mxu0 %vm801_vm0, %v800_v0 }
  0xad   : > { %v225_v9 = vpop.xlane.xlu0 %224 }
  0xae   : > { %676 = vmatpush3.msra.mxu1 %v225_v9 }
  0xaf   : > { %678 = vmatmul.mubr.msk.f32.vlgmr.msra.gmra.mrb[0].mxu1 %vm231_vm1, %v229_v7  ;;  %685 = vmatprep.subr.mxu1 %v800_v0 }
  0xb0   : > { %687 = vmatprep.mubr.msk.f32.mxu1 %vm801_vm0, %v800_v0 }
 0x17e   : > { %v301_v10 = vpop.f32.mrb[0].mxu0 }
 0x17f   : > { %v375_v11 = vmul.f32 0.001953125, %v301_v10  ;;  %v674_v12 = vpop.f32.mrb[1].mxu0 }
 0x181   : > { %v377_v13 = vmul.f32 %v375_v11, %v375_v11  ;;  %681 = vmatpush3.msk.msra.mxu0 %vm384_vm2, %v375_v11 }
 0x182   : > { %v371_v15 = vpop.f32.mrb[0].mxu1  ;;  %683 = vmatmul.mubr.msk.f32.vlgmr.msra.gmra.mrb[2].mxu0 %vm380_vm3, %v230_v14 }
 0x183   : > { %v376_v16 = vmul.f32 0.001953125, %v371_v15  ;;  %v679_v17 = vpop.f32.mrb[1].mxu1 }
 0x185   : > { %v378_v18 = vsub.f32 %v376_v16, %v377_v13 }
 0x187   : > { %v379_v19 = vmax.f32 %v378_v18, 0.0 }
 0x189   : > { %686 = vmatpush3.msk.msra.mxu1 %vm384_vm2, %v379_v19 }
 0x18a   : > { %688 = vmatmul.mubr.msk.f32.vlgmr.msra.gmra.mrb[2].mxu1 %vm380_vm3, %v230_v14 }
 0x255   : > { %v454_v21 = vpop.f32.mrb[2].mxu0 }
 0x256   : > { %v684_v22 = vpop.f32.mrb[3].mxu0 }
 0x25d   : > { %v527_v23 = vpop.f32.mrb[2].mxu1 }
 0x25e   : > { %v528_v24 = vadd.f32 1e-05, %v527_v23  ;;  %v689_v25 = vpop.f32.mrb[3].mxu1 }
 0x260   : > { %734 = vrsqrt.f32 %v528_v24 }
 0x26a   : > { %v735_v28 = vpop.eup %734 }
 0x26b   : > { %v533_v29 = vmul.f32 %v735_v28, %v532_v27 }
 0x26d   : > { %v534_v31 = vmul.f32 %v533_v29, %v454_v21  ;;  %538 = vperm.xlu1 %732, %v533_v29  }
 0x26f   : > { %v535_v32 = vsub.f32 %v647_v30, %v534_v31 }
 0x271   : > { %545 = vperm.xlu1 %732, %v535_v32  }
 0x2ec   : > { %v539_v33 = vpop.permute.xlu1 %538 }
 0x2ed   : > { %v541_v34 = vmul.f32 %v539_v33, %v887_v1  ;;  %v542_v35 = vmul.f32 %v539_v33, %v889_v2 }
 0x2f0   : > { %v546_v36 = vpop.permute.xlu1 %545 }
 0x2f1   : > { %v548_v37 = vadd.f32 %v546_v36, %v541_v34  ;;  %v549_v38 = vadd.f32 %v546_v36, %v542_v35 }
 0x2f3   : > { %550 = vst [vmem:[%s205_s22] sm:$0xff] %v548_v37  ;;  %551 = vst [vmem:[%s205_s22 + $0x8] sm:$0xff] %v549_v38 }
 0x2f4   : > { %749 = shalt.err (!%p746_p3)
}
 0x2f5   : > { %s750_s8 = scalar_lea.hbm %s915_s29, 256  ;;  %s754_s11 = scalar_lea.hbm %s961_s4, 512 }
 0x2f6   : > { %p751_p4 = scmp.ne.s32.totalorder %s915_s29, %s750_s8  ;;  %p755_p9 = scmp.lt.u32.totalorder %s915_s29, %s961_s4 }
 0x2f7   : > { %p756_p10 = scmp.lt.u32.totalorder %s754_s11, %s750_s8  ;;  %p758_p12 = scmp.lt.u32.totalorder %s750_s8, %s915_s29 }
 0x2f8   : > { %p752_p7 = pnand %p751_p4, %p867_p5 }
 0x2f9   : > { %p757_p11 = por %p756_p10, %p755_p9 }
 0x2fa   : > { %p753_p8 = pneg %p752_p7 }
 0x2fb   : > { %p759_p13 = por %p758_p12, %p757_p11 }
 0x2fd   : > { %p760_p0 = pnand %p759_p13, %p753_p8 }
 0x2ff   : > { %763 = shalt.err (!%p760_p0)
}
 0x300   : > { %690 = dma.vmem_to_hbm [thread:$0]  (%p867_p5), %s917_s23, 256, %s915_s29, %s553_s19  }
 0x301 PF: > { %p696_p1 = scmp.ge.s32.totalorder %s798_s18, 2  ;;  %s579_s14 = sand.u32 1, %s786_s15  }
 0x302   : > { %s580_s20 = scalar_lea.sflag [#allocation3], %s579_s14 }
 0x303   : > { %p693_p2 = pnand %p696_p1, %p871_p6 }
 0x305   : > { %781 = dma.done.wait (!%p693_p2), %s580_s20, 256  }
 0x306   : > { %783 = vsyncadd (!%p693_p2), %s580_s20, 4294967040  ;;  %p14_p3 = scmp.ge.s32.totalorder %s854_s21, 4   ;;  %s964_s15 = smov %s790_s16 }
 0x307   : > { %s965_s16 = smov %s794_s17  ;;  %s966_s17 = smov %s865_s24 }
 0x308   : > { %s967_s18 = smov %s854_s21  ;;  %16 = sbr.rel (!%p14_p3) target bundleno = 3 (0x3), region = 75 }
 0x30f   :  { %585 = vsyncpa [#allocation3], 1 }
 0x310   :  { %587 = vsyncpa [#allocation3 + $0x1], 1 }

</bundles_post_ra>
